<compile_context>
chip_gen: v5e
topology: v5e:2x2
jax: 0.10.0
libtpu: 0.0.40
codegen_flags: <defaults>
</compile_context>

<pallas_src>
import jax
import jax.numpy as jnp
from jax.experimental import pallas as pl
from jax.experimental.pallas import tpu as pltpu


def _round_up(x, m):
    return ((x + m - 1) // m) * m


def _pick_tile(total, target):
    """Largest multiple of 128 that divides `total` and is <= max(target, 128)."""
    t = max((min(target, total) // 128) * 128, 128)
    while total % t != 0:
        t -= 128
    return t


def _pad2d(x, rows, cols):
    r, c = x.shape
    if r == rows and c == cols:
        return x
    return jnp.pad(x, ((0, rows - r), (0, cols - c)))


# --------- Phase A: hidden = sigmoid(purchase_vec @ W1 + b1 + user_emb) ---------
# grid = (Hp//th [parallel], Ip//tk [arbitrary / K reduction])
def _hidden_kernel(pv_ref, w1_ref, b1_ref, emb_ref, hid_ref, acc_ref):
    k = pl.program_id(1)

    @pl.when(k == 0)
    def _():
        acc_ref[...] = jnp.zeros_like(acc_ref)

    acc_ref[...] += jnp.dot(pv_ref[...], w1_ref[...],
                            preferred_element_type=jnp.float32)

    @pl.when(k == pl.num_programs(1) - 1)
    def _():
        h = acc_ref[...] + b1_ref[...] + emb_ref[...]
        hid_ref[...] = jax.nn.sigmoid(h).astype(hid_ref.dtype)


# --------- Phase B: out = sigmoid(hidden @ W2 + b2) ---------
def _out_kernel(hid_ref, w2_ref, b2_ref, out_ref):
    # hid_ref is already bf16; bf16 x bf16 MXU dot with f32 accumulation.
    o = jnp.dot(hid_ref[...], w2_ref[...], preferred_element_type=jnp.float32)
    out_ref[...] = jax.nn.sigmoid(o + b2_ref[...]).astype(out_ref.dtype)


def cdae_forward(uid, purchase_vec, params, *, item_tile=2048):
    """uid: (B, 1) int32; purchase_vec: (B, nb_item) f32 -> (B, nb_item) f32."""
    w1, b1 = params["w1"], params["b1"]            # (nb_item, nb_hidden), (1, nb_hidden)
    w2, b2 = params["w2"], params["b2"]            # (nb_hidden, nb_item), (1, nb_item)
    emb_table = params["emb_table"]                # (nb_user, nb_hidden)

    B, nb_item = purchase_vec.shape
    nb_hidden = w1.shape[1]

    # Bp rounded to 16: one full packed bf16 vreg row-group for the bf16 LHS.
    Bp = _round_up(max(B, 16), 16)
    Hp = _round_up(nb_hidden, 128)

    # Hidden tile: >=2 blocks whenever Hp >= 256 so Phase A has a real "parallel"
    # grid axis (shards across both TensorCores on v7x; harmless on v5e/v6e).
    th = _pick_tile(Hp, max(128, Hp // 2))

    # Item tile selection + v7x VMEM guardrail (each streamed bf16 slab buffer
    # <= ~6 MiB so double/triple buffering stays well under 64 MiB VMEM).
    tile = max((item_tile // 128) * 128, 128)
    max_slab_bytes = 6 * 1024 * 1024
    widest = max(th, Hp)                       # Phase A streams (tk, th); Phase B (Hp, tn)
    tile = min(tile, max((max_slab_bytes // (2 * widest)) // 128 * 128, 128))
    Ip128 = _round_up(nb_item, 128)
    tile = min(tile, Ip128)
    t_div = _pick_tile(Ip128, tile)
    if 2 * t_div >= tile:
        # A divisor close to the requested tile exists: use it, no extra padding.
        tile, Ip = t_div, Ip128
    else:
        # Awkward factorization would collapse the tile toward 128:
        # pad the item dim up to a multiple of the tile instead (zeros are no-ops).
        Ip = _round_up(nb_item, tile)
    tk = tn = tile

    # Glue: tiny data-dependent row gather (nn.Embedding(uid).squeeze(1)).
    user_emb = jnp.take(emb_table, uid[:, 0], axis=0).astype(jnp.float32)

    # Zero-pad to TPU-aligned shapes; zero padding is exact for this computation
    # (padded hidden cols give sigmoid(0)=0.5 but meet zero W2 rows; padded
    # batch rows / item cols are sliced off).
    pv = _pad2d(purchase_vec.astype(jnp.bfloat16), Bp, Ip)
    emb = _pad2d(user_emb, Bp, Hp)
    w1p = _pad2d(w1.astype(jnp.bfloat16), Ip, Hp)
    b1p = _pad2d(b1.astype(jnp.float32), 1, Hp)
    w2p = _pad2d(w2.astype(jnp.bfloat16), Hp, Ip)
    b2p = _pad2d(b2.astype(jnp.float32), 1, Ip)

    # ---------------- Phase A ----------------
    need_a = (2 * (Bp * tk * 2 + tk * th * 2 + th * 4 + Bp * th * 4 + Bp * th * 2)
              + Bp * th * 4)
    hidden = pl.pallas_call(
        _hidden_kernel,
        out_shape=jax.ShapeDtypeStruct((Bp, Hp), jnp.bfloat16),
        grid_spec=pltpu.PrefetchScalarGridSpec(
            num_scalar_prefetch=0,
            grid=(Hp // th, Ip // tk),
            in_specs=[
                pl.BlockSpec((Bp, tk), lambda h, k: (0, k)),   # purchase_vec K-slab
                pl.BlockSpec((tk, th), lambda h, k: (k, h)),   # W1 slab (streamed)
                pl.BlockSpec((1, th), lambda h, k: (0, h)),    # b1 tile
                pl.BlockSpec((Bp, th), lambda h, k: (0, h)),   # user embedding tile
            ],
            out_specs=pl.BlockSpec((Bp, th), lambda h, k: (0, h)),
            scratch_shapes=[pltpu.VMEM((Bp, th), jnp.float32)],
        ),
        compiler_params=pltpu.CompilerParams(
            dimension_semantics=("parallel", "arbitrary"),     # (hidden tiles, K reduction)
            vmem_limit_bytes=min(max(2 * need_a, 16 * 1024 * 1024), 48 * 1024 * 1024),
        ),
    )(pv, w1p, b1p, emb)

    # ---------------- Phase B ----------------
    need_b = 2 * (Bp * Hp * 2 + Hp * tn * 2 + tn * 4 + Bp * tn * 4)
    out = pl.pallas_call(
        _out_kernel,
        out_shape=jax.ShapeDtypeStruct((Bp, Ip), jnp.float32),
        grid_spec=pltpu.PrefetchScalarGridSpec(
            num_scalar_prefetch=0,
            grid=(Ip // tn,),
            in_specs=[
                pl.BlockSpec((Bp, Hp), lambda j: (0, 0)),   # hidden (bf16, resident)
                pl.BlockSpec((Hp, tn), lambda j: (0, j)),   # W2 N-slab (streamed)
                pl.BlockSpec((1, tn), lambda j: (0, j)),    # b2 N-slab
            ],
            out_specs=pl.BlockSpec((Bp, tn), lambda j: (0, j)),   # lane-dense output tile
        ),
        compiler_params=pltpu.CompilerParams(
            dimension_semantics=("parallel",),              # independent output tiles
            vmem_limit_bytes=min(max(2 * need_b, 16 * 1024 * 1024), 48 * 1024 * 1024),
        ),
    )(hidden, w2p, b2p)

    return out[:B, :nb_item]


def init_params(key, nb_item, nb_user, nb_hidden):
    """Deterministic init mirroring PyTorch default Linear/Embedding inits."""
    k1, k2, k3, k4, k5 = jax.random.split(key, 5)
    lim1 = 1.0 / jnp.sqrt(nb_item)     # fan_in of item2hidden
    lim2 = 1.0 / jnp.sqrt(nb_hidden)   # fan_in of hidden2out
    return {
        # item2hidden Linear(nb_item -> nb_hidden), stored transposed as (in, out)
        "w1": jax.random.uniform(k1, (nb_item, nb_hidden), jnp.float32, -lim1, lim1),
        "b1": jax.random.uniform(k2, (1, nb_hidden), jnp.float32, -lim1, lim1),
        # hidden2out Linear(nb_hidden -> nb_item), stored transposed as (in, out)
        "w2": jax.random.uniform(k3, (nb_hidden, nb_item), jnp.float32, -lim2, lim2),
        "b2": jax.random.uniform(k4, (1, nb_item), jnp.float32, -lim2, lim2),
        # id2hidden Embedding(nb_user, nb_hidden) ~ N(0, 1)
        "emb_table": jax.random.normal(k5, (nb_user, nb_hidden), jnp.float32),
    }


def reference_forward(uid, purchase_vec, params):
    """Pure-JAX f32 reference for sanity checking."""
    user_emb = jnp.take(params["emb_table"], uid[:, 0], axis=0)
    hidden = jax.nn.sigmoid(purchase_vec @ params["w1"] + params["b1"] + user_emb)
    return jax.nn.sigmoid(hidden @ params["w2"] + params["b2"])


if __name__ == "__main__":
    nb_item, nb_user, nb_hidden, batch = 1024, 16, 128, 8

    key = jax.random.PRNGKey(0)
    kp, ku, kv = jax.random.split(key, 3)

    params = init_params(kp, nb_item, nb_user, nb_hidden)
    uid = jax.random.randint(ku, (batch, 1), 0, nb_user, dtype=jnp.int32)
    purchase_vec = (jax.random.uniform(kv, (batch, nb_item)) < 0.1).astype(jnp.float32)

    # item_tile=512 so the test exercises the multi-step K reduction / N streaming.
    out = cdae_forward(uid, purchase_vec, params, item_tile=512)
    out = jax.block_until_ready(out)

    ref = reference_forward(uid, purchase_vec, params)
    assert out.shape == (batch, nb_item)
    # bf16 weight / hidden streaming -> loosen tolerance vs the pure-f32 reference.
    assert jnp.allclose(out, ref, atol=2e-2, rtol=2e-2), float(jnp.max(jnp.abs(out - ref)))

    print("KERNEL_OK")
</pallas_src>

<mosaic_0001>
module attributes {stable_mosaic.version = 11 : i64} {
  func.func @_hidden_kernel(%arg0: i32, %arg1: i32, %arg2: memref<16x512xbf16, #tpu.memory_space<vmem>>, %arg3: memref<512x128xbf16, #tpu.memory_space<vmem>>, %arg4: memref<1x128xf32, #tpu.memory_space<vmem>>, %arg5: memref<16x128xf32, #tpu.memory_space<vmem>>, %arg6: memref<16x128xbf16, #tpu.memory_space<vmem>>, %arg7: memref<16x128xf32, #tpu.memory_space<vmem>>) attributes {dimension_semantics = [#tpu.dimension_semantics<parallel>, #tpu.dimension_semantics<arbitrary>], iteration_bounds = array<i64: 1, 2>, scalar_prefetch = 0 : i64, scratch_operands = 1 : i64, tpu.core_type = #tpu.core_type<tc>, window_params = [{transform_indices = @transform_0, window_bounds = array<i64: 16, 512>}, {transform_indices = @transform_1, window_bounds = array<i64: 512, 128>}, {transform_indices = @transform_2, window_bounds = array<i64: 1, 128>}, {transform_indices = @transform_3, window_bounds = array<i64: 16, 128>}, {transform_indices = @transform_4, window_bounds = array<i64: 16, 128>}]} {
    %c0_i32 = arith.constant 0 : i32
    %0 = arith.cmpi eq, %arg1, %c0_i32 : i32
    %1 = arith.extui %0 : i1 to i32
    %c0_i32_0 = arith.constant 0 : i32
    %2 = arith.cmpi ne, %1, %c0_i32_0 : i32
    scf.if %2 {
      %cst_9 = arith.constant 0.000000e+00 : f32
      %12 = vector.broadcast %cst_9 : f32 to vector<16x128xf32>
      %c0_10 = arith.constant 0 : index
      %c0_11 = arith.constant 0 : index
      %13 = vector.load %arg7[%c0_10, %c0_11] : memref<16x128xf32, #tpu.memory_space<vmem>>, vector<16x128xf32>
      tpu.vector_store %arg7[%c0_10, %c0_11], %12 {strides = array<i32>} : memref<16x128xf32, #tpu.memory_space<vmem>>, vector<16x128xf32>,
    } else {
    }
    %c0 = arith.constant 0 : index
    %c0_1 = arith.constant 0 : index
    %3 = vector.load %arg7[%c0, %c0_1] : memref<16x128xf32, #tpu.memory_space<vmem>>, vector<16x128xf32>
    %c0_2 = arith.constant 0 : index
    %c0_3 = arith.constant 0 : index
    %4 = vector.load %arg2[%c0_2, %c0_3] : memref<16x512xbf16, #tpu.memory_space<vmem>>, vector<16x512xbf16>
    %c0_4 = arith.constant 0 : index
    %c0_5 = arith.constant 0 : index
    %5 = vector.load %arg3[%c0_4, %c0_5] : memref<512x128xbf16, #tpu.memory_space<vmem>>, vector<512x128xbf16>
    %cst = arith.constant dense<0.000000e+00> : vector<16x128xf32>
    %6 = tpu.matmul %4, %5, %cst {dimension_numbers = #tpu.dot_dimension_numbers<[1], [0], [0], [1], [0, 0, 1, 1], [], []>} : vector<16x512xbf16>, vector<512x128xbf16>, vector<16x128xf32> -> vector<16x128xf32>
    %7 = arith.addf %3, %6 : vector<16x128xf32>
    %c0_6 = arith.constant 0 : index
    %c0_7 = arith.constant 0 : index
    %8 = vector.load %arg7[%c0_6, %c0_7] : memref<16x128xf32, #tpu.memory_space<vmem>>, vector<16x128xf32>
    tpu.vector_store %arg7[%c0_6, %c0_7], %7 {strides = array<i32>} : memref<16x128xf32, #tpu.memory_space<vmem>>, vector<16x128xf32>,
    %c1_i32 = arith.constant 1 : i32
    %9 = arith.cmpi eq, %arg1, %c1_i32 : i32
    %10 = arith.extui %9 : i1 to i32
    %c0_i32_8 = arith.constant 0 : i32
    %11 = arith.cmpi ne, %10, %c0_i32_8 : i32
    scf.if %11 {
      %c0_9 = arith.constant 0 : index
      %c0_10 = arith.constant 0 : index
      %12 = vector.load %arg7[%c0_9, %c0_10] : memref<16x128xf32, #tpu.memory_space<vmem>>, vector<16x128xf32>
      %c0_11 = arith.constant 0 : index
      %c0_12 = arith.constant 0 : index
      %13 = vector.load %arg4[%c0_11, %c0_12] : memref<1x128xf32, #tpu.memory_space<vmem>>, vector<1x128xf32>
      %14 = vector.broadcast %13 : vector<1x128xf32> to vector<16x128xf32>
      %15 = arith.addf %12, %14 : vector<16x128xf32>
      %c0_13 = arith.constant 0 : index
      %c0_14 = arith.constant 0 : index
      %16 = vector.load %arg5[%c0_13, %c0_14] : memref<16x128xf32, #tpu.memory_space<vmem>>, vector<16x128xf32>
      %17 = arith.addf %15, %16 : vector<16x128xf32>
      %18 = arith.negf %17 : vector<16x128xf32>
      %19 = math.exp %18 : vector<16x128xf32>
      %cst_15 = arith.constant 1.000000e+00 : f32
      %20 = vector.broadcast %cst_15 : f32 to vector<16x128xf32>
      %21 = arith.addf %20, %19 : vector<16x128xf32>
      %22 = arith.divf %20, %21 : vector<16x128xf32>
      %23 = arith.truncf %22 : vector<16x128xf32> to vector<16x128xbf16>
      %c0_16 = arith.constant 0 : index
      %c0_17 = arith.constant 0 : index
      %24 = vector.load %arg6[%c0_16, %c0_17] : memref<16x128xbf16, #tpu.memory_space<vmem>>, vector<16x128xbf16>
      tpu.vector_store %arg6[%c0_16, %c0_17], %23 {strides = array<i32>} : memref<16x128xbf16, #tpu.memory_space<vmem>>, vector<16x128xbf16>,
    } else {
    }
    return
  }
  func.func @transform_0(%arg0: i32, %arg1: i32) -> (i32, i32) {
    %c0_i32 = arith.constant 0 : i32
    %c0_i32_0 = arith.constant 0 : i32
    return %c0_i32, %arg1 : i32, i32
  }
  func.func @transform_1(%arg0: i32, %arg1: i32) -> (i32, i32) {
    %c0_i32 = arith.constant 0 : i32
    return %arg1, %arg0 : i32, i32
  }
  func.func @transform_2(%arg0: i32, %arg1: i32) -> (i32, i32) {
    %c0_i32 = arith.constant 0 : i32
    %c0_i32_0 = arith.constant 0 : i32
    return %c0_i32, %arg0 : i32, i32
  }
  func.func @transform_3(%arg0: i32, %arg1: i32) -> (i32, i32) {
    %c0_i32 = arith.constant 0 : i32
    %c0_i32_0 = arith.constant 0 : i32
    return %c0_i32, %arg0 : i32, i32
  }
  func.func @transform_4(%arg0: i32, %arg1: i32) -> (i32, i32) {
    %c0_i32 = arith.constant 0 : i32
    %c0_i32_0 = arith.constant 0 : i32
    return %c0_i32, %arg0 : i32, i32
  }
}

</mosaic_0001>

<bundles_post_ra>
// kernel: tpu_custom_call.1
= control target key start
LH: loop header
LB: loop body
LE: loop exit
PB: predicated region body
PF: predicated region fallthrough
CT: control target
= control target key end

     0   :  { %s1539_s0 = inlined_call_operand.hbm [shape: bf16[16,1024], index: 0, kind: input, shape index: {}]   ;;  %s1540_s1 = inlined_call_operand.hbm [shape: bf16[1024,128], index: 1, kind: input, shape index: {}]   ;;  %s1541_s2 = inlined_call_operand.vmem [shape: f32[1,128], index: 2, kind: input, shape index: {}]   ;;  %s1542_s3 = inlined_call_operand.hbm [shape: f32[16,128], index: 3, kind: input, shape index: {}]   ;;  %s1543_s4 = inlined_call_operand.hbm [shape: bf16[16,128], index: 4, kind: output, shape index: {}]  }
   0x1   :  { %1545 = sst [smem:[#allocation16_spill]] %s1539_s0 }
   0x2   :  { %1546 = sst [smem:[#allocation17_spill]] %s1542_s3 }
   0x3   :  { %9 = vsyncpa [#allocation4], 0 }
   0x4   :  { %11 = vsyncpa [#allocation4 + $0x1], 0 }
   0x5   :  { %12 = vsyncpa [#allocation7], 0 }
   0x6   :  { %14 = vsyncpa [#allocation7 + $0x1], 0 }
   0x7   :  { %15 = vsyncpa [#allocation5], 0  ;;  %s1361_s15 = smov 0   ;;  %s1363_s16 = smov 0  }
   0x8   :  { %s1365_s17 = smov 0   ;;  %s1367_s18 = smov 0  }
   0x9   :  { %s1369_s19 = smov 0   ;;  %s1371_s20 = smov 0  }
   0xa LB: > { %s1390_s21 = sadd.s32 4294967295, %s1322_s20   ;;  %p53_p0 = scmp.ne.s32.totalorder %s1306_s16, %s1302_s15  ;;  %s1322_s20 = sphi %s1371_s20, %s21_s20   ;;  %s1318_s19 = sphi %s1369_s19, %s1561_s19   ;;  %s1314_s18 = sphi %s1367_s18, %s1560_s18   ;;  %s1310_s17 = sphi %s1365_s17, %s1559_s17   ;;  %s1306_s16 = sphi %s1363_s16, %s1558_s16   ;;  %s1302_s15 = sphi %s1361_s15, %s1557_s15  }
   0xb   : > { %p54_p1 = scmp.eq.s32.totalorder %s1390_s21, 0  ;;  %p836_p2 = scmp.ge.s32.totalorder %s1322_s20, 1 }
   0xc   : > { %p170_p3 = scmp.lt.s32.totalorder %s1322_s20, 3  ;;  %s1548_s3 = sld [smem:[#allocation17_spill]] }
   0xd   : > { %p1398_p4 = por %p54_p1, %p53_p0  ;;  %s1324_s27 = smov [#allocation8]  }
   0xe   : > { %p1405_p5 = pnand %p836_p2, %p170_p3  ;;  %s191_s28 = sshll.u32 %s1324_s27, 4  ;;  %s192_s28 = int_to_ptr.vmem [resolvable:$true] %s191_s28 }
   0xf   : > { %s1325_s29 = smov 128   ;;  %s1326_s30 = smov 8  }
  0x10   : > { %p1057_p6 = pneg %p1405_p5  ;;  %s30_s5 = sadd.s32 1, %s1318_s19 }
  0x11   : > { %p31_p8 = scmp.ge.s32.totalorder %s30_s5, 2  ;;  %s40_s6 = sadd.s32 1, %s1310_s17 }
  0x12   : > { %s189_s25 = sshll.u32 %s1548_s3, 4  ;;  %p1058_p7 = pnand %p1057_p6, %p54_p1  ;;  %s190_s25 = int_to_ptr.hbm [resolvable:$true] %s189_s25 }
  0x13   : > { %p47_p9 = scmp.ne.s32.totalorder %s1310_s17, %s1306_s16  ;;  %p48_p10 = scmp.eq.s32.totalorder %s1322_s20, 0 }
  0x14   : > { %1060 = dma.hbm_to_vmem [thread:$0]  (!%p1058_p7), %s190_s25, 256, %s192_s28, [#allocation7], %s1325_s29, %s1325_s29, %s1326_s30  }
  0x15   : > { %s1563_s5 = smov (%p31_p8, %s30_s5), 0  ;;  %p1420_p11 = por %p48_p10, %p47_p9 }
  0x16   : > { %1550 = sst [smem:[#allocation14_spill]] %s1563_s5  ;;  %p1069_p12 = scmp.lt.s32.totalorder %s1322_s20, 2 }
  0x17   : > { %s37_s8 = ssub.s32 %s1318_s19, %s1563_s5  ;;  %s205_s9 = sand.u32 1, %s1310_s17  }
  0x18   : > { %p38_p13 = scmp.eq.s32.totalorder %s37_s8, 0  ;;  %s840_s10 = sshll.u32 %s205_s9, 5 }
  0x19   : > { %s1002_s11 = sshll.u32 %s1318_s19, 4  ;;  %s1553_s0 = sld [smem:[#allocation16_spill]] }
  0x1a   : > { %s1430_s12 = scalar_select %p38_p13, %s1310_s17, %s40_s6  }
  0x1b   : > { %s209_s24 = scalar_lea.vmem [#allocation3], %s840_s10  ;;  %p1439_p0 = pnand %p1069_p12, %p1420_p11 }
  0x1c   : > { %1552 = sst [smem:[#allocation15_spill]] %s1430_s12  ;;  %s217_s25 = sshll.u32 %s209_s24, 4  ;;  %s218_s25 = int_to_ptr.vmem [resolvable:$true] %s217_s25 }
  0x1d   : > { %s227_s28 = sand.u32 1, %s1322_s20   ;;  %s206_s29 = scalar_lea.sflag [#allocation4], %s205_s9 }
  0x1e   : > { %s1327_s30 = smov 512   ;;  %s1328_s6 = smov 256  }
  0x1f   : > { %s214_s15 = scalar_lea.hbm %s1553_s0, %s1002_s11  ;;  %s1329_s8 = smov 16  }
  0x20   : > { %s215_s23 = sshll.u32 %s214_s15, 4  ;;  %s843_s11 = sshll.u32 %s205_s9, 8  ;;  %s216_s23 = int_to_ptr.hbm [resolvable:$true] %s215_s23 }
  0x21   : > { %1064 = dma.hbm_to_vmem [thread:$0]  (!%p1439_p0), %s216_s23, 512, %s218_s25, %s206_s29, %s1327_s30, %s1328_s6, %s1329_s8  }
  0x22   : > { %s1003_s10 = sshll.u32 %s1318_s19, 8  ;;  %s231_s15 = scalar_lea.vmem [#allocation6], %s843_s11 }
  0x23   : > { %s237_s7 = scalar_lea.hbm %s1540_s1, %s1003_s10  ;;  %s240_s24 = sshll.u32 %s231_s15, 4  ;;  %s241_s24 = int_to_ptr.vmem [resolvable:$true] %s240_s24 }
  0x24   : > { %s238_s0 = sshll.u32 %s237_s7, 4  ;;  %s228_s3 = scalar_lea.sflag [#allocation7], %s227_s28  ;;  %s239_s0 = int_to_ptr.hbm [resolvable:$true] %s238_s0 }
  0x25   : > { %s1330_s5 = smov 64   ;;  %s1331_s12 = smov 4  }
  0x26   : > { %1067 = dma.hbm_to_vmem [thread:$0]  (!%p1439_p0), %s239_s0, 4096, %s241_s24, %s228_s3, %s1330_s5, %s1330_s5, %s1331_s12  }
  0x27   : > { %252 = sbr.rel (%p1405_p5) target bundleno = 289 (0x121), region = 36  ;;  %s254_s9 = sand.u32 (!%p1405_p5), 1, %s1306_s16  }
  0x28   : > { %s847_s23 = sshll.u32 (!%p1405_p5), %s254_s9, 5  ;;  %s255_s25 = scalar_lea.sflag (!%p1405_p5), [#allocation4], %s254_s9 }
  0x29   : > { %s1455_s29 = scalar_lea.vmem (!%p1405_p5), [#allocation3], %s847_s23 }
  0x2c   : > { %1285 = dma.done.wait (%p1398_p4), %s255_s25, 512  }
  0x2d   : > { %1287 = vsyncadd (%p1398_p4), %s255_s25, 4294966784  ;;  %s264_s28 = sand.u32 1, %s1390_s21   ;;  %s848_s27 = sshll.u32 %s254_s9, 8 }
  0x2e   : > { %s265_s0 = scalar_lea.sflag [#allocation7], %s264_s28  ;;  %s1462_s3 = scalar_lea.vmem [#allocation6], %s848_s27 }
  0x2f   : > { %1289 = dma.done.wait (%p1398_p4), %s265_s0, 4096  }
  0x30   : > { %1291 = vsyncadd (%p1398_p4), %s265_s0, 4294963200 }
  0x31   : > { %1293 = dma.done.wait (%p54_p1), [#allocation7], 256  }
  0x32   : > { %1295 = vsyncadd (%p54_p1), [#allocation7], 4294967040  ;;  %p850_p2 = scmp.ne.s32.totalorder %s1314_s18, 0 }
  0x34   : > { %310 = sbr.rel (%p850_p2) target bundleno = 60 (0x3c), region = 52 }
  0x39   : > { %v1332_v0 = vmov 0.0  }
  0x3a   : > { %311 = vst [vmem:[#allocation2] sm:$0xff] %v1332_v0 }
  0x3b   : > { %312 = vst [vmem:[#allocation2 + $0x8] sm:$0xff] %v1332_v0 }
  0x3c PF: > { %v1015_v1 = vld [vmem:[%s1462_s3 + $0x38] sm:$0xff]  ;;  %v1014_v5 = vld [vmem:[%s1462_s3 + $0x30] sm:$0xff]  ;;  %v1013_v9 = vld [vmem:[%s1462_s3 + $0x28] sm:$0xff]  ;;  %p995_p1 = scmp.ne.s32.totalorder %s1314_s18, 1 }
  0x3d   : > { %v1023_v2 = vld [vmem:[%s1462_s3 + $0x78] sm:$0xff]  ;;  %595 = vmatpush.bf16.msra.mxu0 %v1015_v1  ;;  %v1022_v6 = vld [vmem:[%s1462_s3 + $0x70] sm:$0xff]  ;;  %v1021_v10 = vld [vmem:[%s1462_s3 + $0x68] sm:$0xff] }
  0x3e   : > { %v1031_v3 = vld [vmem:[%s1462_s3 + $0xb8] sm:$0xff]  ;;  %609 = vmatpush.bf16.msra.mxu1 %v1023_v2  ;;  %v1030_v7 = vld [vmem:[%s1462_s3 + $0xb0] sm:$0xff]  ;;  %v1029_v11 = vld [vmem:[%s1462_s3 + $0xa8] sm:$0xff] }
  0x3f   : > { %v1039_v4 = vld [vmem:[%s1462_s3 + $0xf8] sm:$0xff]  ;;  %623 = vmatpush.bf16.msra.mxu2 %v1031_v3  ;;  %v1038_v8 = vld [vmem:[%s1462_s3 + $0xf0] sm:$0xff]  ;;  %v1037_v12 = vld [vmem:[%s1462_s3 + $0xe8] sm:$0xff] }
  0x40   : > { %637 = vmatpush.bf16.msra.mxu3 %v1039_v4  ;;  %v1012_v13 = vld [vmem:[%s1462_s3 + $0x20] sm:$0xff]  ;;  %v1011_v17 = vld [vmem:[%s1462_s3 + $0x18] sm:$0xff]  ;;  %v1010_v21 = vld [vmem:[%s1462_s3 + $0x10] sm:$0xff] }
  0x41   : > { %596 = vmatpush.bf16.msra.mxu0 %v1014_v5  ;;  %v1020_v14 = vld [vmem:[%s1462_s3 + $0x60] sm:$0xff]  ;;  %v1019_v18 = vld [vmem:[%s1462_s3 + $0x58] sm:$0xff]  ;;  %v1018_v22 = vld [vmem:[%s1462_s3 + $0x50] sm:$0xff] }
  0x42   : > { %610 = vmatpush.bf16.msra.mxu1 %v1022_v6  ;;  %v1028_v15 = vld [vmem:[%s1462_s3 + $0xa0] sm:$0xff]  ;;  %v1027_v19 = vld [vmem:[%s1462_s3 + $0x98] sm:$0xff]  ;;  %v1026_v23 = vld [vmem:[%s1462_s3 + $0x90] sm:$0xff] }
  0x43   : > { %624 = vmatpush.bf16.msra.mxu2 %v1030_v7  ;;  %v1036_v16 = vld [vmem:[%s1462_s3 + $0xe0] sm:$0xff]  ;;  %v1035_v20 = vld [vmem:[%s1462_s3 + $0xd8] sm:$0xff]  ;;  %v1034_v24 = vld [vmem:[%s1462_s3 + $0xd0] sm:$0xff] }
  0x44   : > { %638 = vmatpush.bf16.msra.mxu3 %v1038_v8  ;;  %v1009_v25 = vld [vmem:[%s1462_s3 + $0x8] sm:$0xff]  ;;  %v1008_v29 = vld [vmem:[%s1462_s3] sm:$0xff]  ;;  %v1006_v34 = vld [vmem:[%s1455_s29 + $0xc] sm:$0xf0] }
  0x45   : > { %597 = vmatpush.bf16.msra.mxu0 %v1013_v9  ;;  %v1017_v26 = vld [vmem:[%s1462_s3 + $0x48] sm:$0xff]  ;;  %v1016_v30 = vld [vmem:[%s1462_s3 + $0x40] sm:$0xff]  ;;  %v855_v36 = vld [vmem:[%s1455_s29 + $0x10] sm:$0xf0] }
  0x46   : > { %611 = vmatpush.bf16.msra.mxu1 %v1021_v10  ;;  %v1025_v27 = vld [vmem:[%s1462_s3 + $0x88] sm:$0xff]  ;;  %v1024_v31 = vld [vmem:[%s1462_s3 + $0x80] sm:$0xff]  ;;  %v1007_v38 = vld [vmem:[%s1455_s29 + $0x14] sm:$0xf0] }
  0x47   : > { %625 = vmatpush.bf16.msra.mxu2 %v1029_v11  ;;  %v1033_v28 = vld [vmem:[%s1462_s3 + $0xc8] sm:$0xff]  ;;  %v1032_v32 = vld [vmem:[%s1462_s3 + $0xc0] sm:$0xff]  ;;  %v863_v40 = vld [vmem:[%s1455_s29 + $0x18] sm:$0xf0] }
  0x48   : > { %639 = vmatpush.bf16.msra.mxu3 %v1037_v12  ;;  %v853_v33 = vld [vmem:[%s1455_s29] sm:$0xf]  ;;  %v1004_v35 = vld [vmem:[%s1455_s29 + $0x4] sm:$0xf]  ;;  %v861_v37 = vld [vmem:[%s1455_s29 + $0x8] sm:$0xf] }
  0x49   : > { %598 = vmatpush.bf16.msra.mxu0 %v1012_v13  ;;  %v1005_v39 = vld [vmem:[%s1455_s29 + $0xc] sm:$0xf]  ;;  %v854_v41 = vor.u32 %v1006_v34, %v853_v33  ;;  %v858_v42 = vor.u32 %v1004_v35, %v855_v36  ;;  %v862_v43 = vor.u32 %v1007_v38, %v861_v37  ;;  %v313_v51 = vld [vmem:[#allocation2] sm:$0xff]  ;;  %v314_v59 = vld [vmem:[#allocation2 + $0x8] sm:$0xff] }
  0x4a   : > { %612 = vmatpush.bf16.msra.mxu1 %v1020_v14  ;;  %v866_v44 = vor.u32 %v1005_v39, %v863_v40 }
  0x4b   : > { %626 = vmatpush.bf16.msra.mxu2 %v1028_v15 }
  0x4c   : > { %640 = vmatpush.bf16.msra.mxu3 %v1036_v16 }
  0x4d   : > { %599 = vmatpush.bf16.msra.mxu0 %v1011_v17 }
  0x4e   : > { %613 = vmatpush.bf16.msra.mxu1 %v1019_v18 }
  0x4f   : > { %627 = vmatpush.bf16.msra.mxu2 %v1027_v19 }
  0x50   : > { %641 = vmatpush.bf16.msra.mxu3 %v1035_v20 }
  0x51   : > { %600 = vmatpush.bf16.msra.mxu0 %v1010_v21 }
  0x52   : > { %614 = vmatpush.bf16.msra.mxu1 %v1018_v22 }
  0x53   : > { %628 = vmatpush.bf16.msra.mxu2 %v1026_v23 }
  0x54   : > { %642 = vmatpush.bf16.msra.mxu3 %v1034_v24 }
  0x55   : > { %601 = vmatpush.bf16.msra.mxu0 %v1009_v25 }
  0x56   : > { %615 = vmatpush.bf16.msra.mxu1 %v1017_v26 }
  0x57   : > { %629 = vmatpush.bf16.msra.mxu2 %v1025_v27 }
  0x58   : > { %643 = vmatpush.bf16.msra.mxu3 %v1033_v28 }
  0x59   : > { %602 = vmatpush.bf16.msra.mxu0 %v1008_v29 }
  0x5a   : > { %616 = vmatpush.bf16.msra.mxu1 %v1016_v30 }
  0x5b   : > { %630 = vmatpush.bf16.msra.mxu2 %v1024_v31 }
  0x5c   : > { %644 = vmatpush.bf16.msra.mxu3 %v1032_v32  ;;  %603 = vmatmul.bf16.vlgmr.msra.gmra.mxu0 %v854_v41 }
  0x5d   : > { %617 = vmatmul.bf16.vlgmr.msra.gmra.mxu1 %v858_v42 }
  0x5e   : > { %631 = vmatmul.bf16.vlgmr.msra.gmra.mxu2 %v862_v43 }
  0x5f   : > { %645 = vmatmul.bf16.vlgmr.msra.gmra.mxu3 %v866_v44 }
  0xd9   : > { %v604_v45 = vpop.f32.mrf.mxu0 }
  0xda   : > { %v618_v46 = vpop.f32.mrf.mxu1 }
  0xdb   : > { %v619_v47 = vadd.f32 %v618_v46, %v604_v45 }
  0xe1   : > { %v632_v48 = vpop.f32.mrf.mxu2  ;;  %v606_v53 = vpop.f32.mrf.mxu0 }
  0xe2   : > { %v646_v49 = vpop.f32.mrf.mxu3  ;;  %v633_v50 = vadd.f32 %v632_v48, %v619_v47  ;;  %v620_v54 = vpop.f32.mrf.mxu1 }
  0xe3   : > { %v621_v56 = vadd.f32 %v620_v54, %v606_v53 }
  0xe4   : > { %v647_v52 = vadd.f32 %v646_v49, %v633_v50 }
  0xe6   : > { %v651_v55 = vadd.f32 %v647_v52, %v313_v51 }
  0xe8   : > { %653 = vst [vmem:[#allocation2] sm:$0xff] %v651_v55 }
  0xe9   : > { %v634_v57 = vpop.f32.mrf.mxu2 }
  0xea   : > { %v635_v58 = vadd.f32 %v634_v57, %v621_v56  ;;  %v648_v60 = vpop.f32.mrf.mxu3 }
  0xec   : > { %v649_v61 = vadd.f32 %v648_v60, %v635_v58  ;;  %658 = sbr.rel (%p995_p1) target bundleno = 283 (0x11b), region = 56 }
  0xee   : > { %v652_v62 = vadd.f32 %v649_v61, %v314_v59 }
  0xf0   : > { %654 = vst [vmem:[#allocation2 + $0x8] sm:$0xff] %v652_v62 }
  0xf1   : > { %v659_v63 = vld [vmem:[#allocation2] sm:$0xff]  ;;  %v667_v2 = vld [vmem:[#allocation8] sm:$0xff]  ;;  %v668_v3 = vld [vmem:[#allocation8 + $0x8] sm:$0xff] }
  0xf2   : > { %v1133_v1 = vld [vmem:[%s1541_s2] ss:$0 sm:$0xff] }
  0xf3   : > { %v665_v4 = vadd.f32 %v1133_v1, %v659_v63 }
  0xf5   : > { %v669_v6 = vadd.f32 %v667_v2, %v665_v4 }
  0xf7   : > { %v660_v0 = vld [vmem:[#allocation2 + $0x8] sm:$0xff]  ;;  %v996_v8 = vmul.f32 -1.442695, %v669_v6 }
  0xf8   : > { %v666_v5 = vadd.f32 %v1133_v1, %v660_v0 }
  0xf9   : > { %1134 = vpow2.f32 %v996_v8 }
  0xfa   : > { %v670_v7 = vadd.f32 %v668_v3, %v666_v5 }
  0xfc   : > { %v997_v9 = vmul.f32 -1.442695, %v670_v7 }
  0xfe   : > { %1136 = vpow2.f32 %v997_v9 }
  0xff   : > { %v1135_v10 = vpop.eup %1134 }
 0x100   : > { %v677_v12 = vadd.f32 1.0, %v1135_v10 }
 0x102   : > { %1138 = vrcp.f32 %v677_v12  ;;  %vm684_vm0 = vweird.f32 %v677_v12  ;;  %v690_v17 = vand.u32 2147483648, %v677_v12  ;;  %v688_v20 = vand.u32 2147483647, %v677_v12 }
 0x104   : > { %v1137_v11 = vpop.eup %1136  ;;  %v691_v25 = vor.u32 1.1754944e-38, %v690_v17  ;;  %vm689_vm5 = vcmp.eq.f32.partialorder %v688_v20, 8.507059e+37 }
 0x105   : > { %v678_v13 = vadd.f32 1.0, %v1137_v11 }
 0x107   : > { %1140 = vrcp.f32 %v678_v13  ;;  %v705_v21 = vand.u32 2147483648, %v678_v13  ;;  %vm699_vm2 = vweird.f32 %v678_v13  ;;  %v703_v23 = vand.u32 2147483647, %v678_v13 }
 0x108   : > { %v1139_v14 = vpop.eup %1138 }
 0x109   : > { %v680_v16 = vmul.f32 %v1139_v14, %v677_v12  ;;  %vm685_vm1 = vweird.f32 %v1139_v14  ;;  %v706_v28 = vor.u32 1.1754944e-38, %v705_v21  ;;  %vm704_vm7 = vcmp.eq.f32.partialorder %v703_v23, 8.507059e+37 }
 0x10a   : > { %vm686_vm4 = vmor %vm684_vm0, %vm685_vm1 }
 0x10b   : > { %v681_v19 = vsub.f32 1.0, %v680_v16 }
 0x10d   : > { %v1141_v15 = vpop.eup %1140  ;;  %v682_v24 = vmul.f32 %v1139_v14, %v681_v19 }
 0x10e   : > { %v695_v18 = vmul.f32 %v1141_v15, %v678_v13  ;;  %vm700_vm3 = vweird.f32 %v1141_v15 }
 0x10f   : > { %v683_v27 = vadd.f32 %v1139_v14, %v682_v24  ;;  %vm701_vm6 = vmor %vm699_vm2, %vm700_vm3 }
 0x110   : > { %v696_v22 = vsub.f32 1.0, %v695_v18 }
 0x111   : > { %v687_v30 = vsel %vm686_vm4, %v1139_v14, %v683_v27 }
 0x112   : > { %v697_v26 = vmul.f32 %v1141_v15, %v696_v22  ;;  %v692_v31 = vsel %vm689_vm5, %v691_v25, %v687_v30 }
 0x114   : > { %v698_v29 = vadd.f32 %v1141_v15, %v697_v26 }
 0x116   : > { %v702_v32 = vsel %vm701_vm6, %v1141_v15, %v698_v29 }
 0x117   : > { %v707_v33 = vsel %vm704_vm7, %v706_v28, %v702_v32 }
 0x118   : > { %v1043_v34 = vpack.c.bf16 %v707_v33, %v692_v31 }
 0x11a   : > { %1044 = vst [vmem:[#allocation9] sm:$0xff] %v1043_v34  }
 0x11b PF: > { %p1071_p3 = scmp.eq.s32.totalorder %s1390_s21, 1  ;;  %s722_s12 = sshll.u32 %s1543_s4, 4  ;;  %s723_s12 = int_to_ptr.hbm [resolvable:$true] %s722_s12 }
 0x11c   : > { %s1333_s30 = smov [#allocation9]   ;;  %s1334_s8 = smov 64  }
 0x11d   : > { %s720_s6 = sshll.u32 %s1333_s30, 4  ;;  %s1335_s11 = smov 4   ;;  %s721_s6 = int_to_ptr.vmem [resolvable:$true] %s720_s6 }
 0x11e   : > { %1054 = dma.vmem_to_hbm [thread:$0]  (%p1071_p3), %s721_s6, 128, %s723_s12, [#allocation5], %s1334_s8, %s1334_s8, %s1335_s11  }
 0x11f   : > { %1297 = dma.done.wait (%p1071_p3), [#allocation5], 128  }
 0x120   : > { %1299 = vsyncadd (%p1071_p3), [#allocation5], 4294967168 }
 0x121 PF: > { %s21_s20 = sadd.s32 1, %s1322_s20   ;;  %s1555_s21 = sld [smem:[#allocation15_spill]] }
 0x122   : > { %p18_p4 = scmp.ge.s32.totalorder %s21_s20, 4   ;;  %s1556_s10 = sld [smem:[#allocation14_spill]] }
 0x123   : > { %s1557_s15 = smov %s1306_s16  ;;  %s1558_s16 = smov %s1310_s17 }
 0x124   : > { %s1560_s18 = smov %s1318_s19  ;;  %20 = sbr.rel (!%p18_p4) target bundleno = 10 (0xa), region = 103 }
 0x127   : > { %s1559_s17 = smov %s1555_s21 }
 0x128   : > { %s1561_s19 = smov %s1556_s10 }
 0x129   :  { %739 = vsyncpa [#allocation4], 1 }
 0x12a   :  { %741 = vsyncpa [#allocation4 + $0x1], 1 }
 0x12b   :  { %742 = vsyncpa [#allocation7], 1 }
 0x12c   :  { %744 = vsyncpa [#allocation7 + $0x1], 1 }
 0x12d   :  { %745 = vsyncpa [#allocation5], 1 }
 0x12e   :  { %747 = vsyncpa [#allocation5 + $0x1], 1 }

</bundles_post_ra>
